<compile_context>
chip_gen: v6e
topology: v6e:2x2x1
jax: 0.10.0
libtpu: 0.0.40
codegen_flags: <defaults>
</compile_context>

<pallas_src>
import jax
import jax.numpy as jnp
from jax.experimental import pallas as pl
from jax.experimental.pallas import tpu as pltpu

LANES = 128


# ----------------------------- parameter setup ------------------------------

def manual_norm(w):
    """Normalize each (kh, kw) filter to unit L2 norm."""
    n = jnp.sqrt(jnp.sum(w * w, axis=(-2, -1), keepdims=True))
    return w / n


def _pad_and_center(psf, shape):
    """Zero-pad a (..., kh, kw) PSF to `shape` and circularly center it."""
    kh, kw = psf.shape[-2], psf.shape[-1]
    padded = jnp.zeros(psf.shape[:-2] + tuple(shape), psf.dtype)
    padded = padded.at[..., :kh, :kw].set(psf)
    return jnp.roll(padded, shift=(-(kh // 2), -(kw // 2)), axis=(-2, -1))


def psf2otf_r(psf, shape):
    """Half-plane OTF: rfft2 of the padded/centered PSF. (..., H, W//2+1)."""
    return jnp.fft.rfft2(_pad_and_center(psf, shape))


def psf2otf_full(psf, shape):
    """Full-plane OTF (reference path only)."""
    return jnp.fft.fft2(_pad_and_center(psf, shape))


# ------------------------------ Pallas kernel -------------------------------

def _wiener_kernel(yr_ref, yi_ref, hr_ref, hi_ref, reg_ref, xr_ref, xi_ref):
    # yr/yi/hr/hi/xr/xi: (bt, tL) f32 blocks; reg: (1, tL) f32 block, already
    # pre-scaled by exp(alpha) in the wrapper (batch-invariant, broadcasts
    # along the batch sublanes).
    yr = yr_ref[...]
    yi = yi_ref[...]
    hr = hr_ref[...]
    hi = hi_ref[...]
    reg = reg_ref[...]

    denom = hr * hr + hi * hi + reg            # |H|^2 + exp(alpha)*sum|G|^2
    # EUP approximate reciprocal + one Newton step (keeps ~1e-7 rel error,
    # frees the VALU slots for the multiplies).
    inv = pl.reciprocal(denom, approx=True)
    inv = inv * (2.0 - denom * inv)
    xr_ref[...] = (hr * yr + hi * yi) * inv    # Re{conj(H) * Y} / D
    xi_ref[...] = (hr * yi - hi * yr) * inv    # Im{conj(H) * Y} / D


def _pick_tiles(B, P, *, step_bytes=4 << 20, vmem_buf_bytes=20 << 20,
                min_steps=4):
    """Pick (bt, tL) for blocks of the flattened (B, P) frequency planes.

    Targets ~2-8 MiB of streamed DMA per grid step across the 6 planes,
    keeps >= `min_steps` frequency steps when the plane is large enough, and
    caps the double-buffered VMEM footprint (including sublane padding)."""
    bt = B if B <= 8 else 8                 # sub-full batch blocks must be 8-aligned
    buf_rows = -(-bt // 8) * 8              # sublane padding of each VMEM buffer
    nl_total = pl.cdiv(P, LANES)            # number of 128-lane groups

    cap_bytes = max(1, step_bytes // (6 * 4 * bt * LANES))          # DMA sweet spot
    cap_vmem = max(1, vmem_buf_bytes // (12 * 4 * buf_rows * LANES))  # 6 planes x2 buf
    cap_steps = max(1, nl_total // min_steps)                       # keep the pipeline fed

    tl_lanes = min(cap_bytes, cap_vmem, cap_steps)
    return bt, tl_lanes * LANES


def wiener_freq_combine(yr, yi, hr, hi, reg):
    """Per-frequency Wiener combine on the rfft2 half-plane.

    yr/yi/hr/hi: (B, H, Wr) f32, reg: (H, Wr) f32 (already exp(alpha)-scaled).
    Returns xr, xi with shape (B, H, Wr)."""
    B, Hf, Wf = yr.shape
    P = Hf * Wf
    bt, tL = _pick_tiles(B, P)
    nb = pl.cdiv(B, bt)
    nl = pl.cdiv(P, tL)

    # Free, contiguous reshapes -- no jnp.pad copies.  The ragged last
    # frequency block (P is generally not a multiple of 128 after rfft2) is
    # handled by Pallas boundary masking.
    def flat(a):
        return a.reshape(B, P).astype(jnp.float32)

    reg_f = reg.reshape(1, P).astype(jnp.float32)

    img_spec = pl.BlockSpec((bt, tL), lambda b, l: (b, l))
    reg_spec = pl.BlockSpec((1, tL), lambda b, l: (0, l))

    # VMEM accounting: 6 streamed planes x 2 buffers (sublane-padded rows)
    # + the double-buffered reg block, plus headroom for internal scratch.
    buf_rows = -(-bt // 8) * 8
    vmem_need = (12 * buf_rows + 2 * 8) * tL * 4
    vmem_limit = int(min(48 << 20, max(16 << 20, vmem_need + (8 << 20))))

    xr_f, xi_f = pl.pallas_call(
        _wiener_kernel,
        out_shape=(jax.ShapeDtypeStruct((B, P), jnp.float32),
                   jax.ShapeDtypeStruct((B, P), jnp.float32)),
        grid_spec=pltpu.PrefetchScalarGridSpec(
            num_scalar_prefetch=0,
            grid=(nb, nl),
            in_specs=[img_spec, img_spec,    # Y real / imag
                      img_spec, img_spec,    # H real / imag
                      reg_spec],             # pre-scaled regularizer plane
            out_specs=[img_spec, img_spec],
        ),
        compiler_params=pltpu.CompilerParams(
            dimension_semantics=("parallel", "parallel"),
            vmem_limit_bytes=vmem_limit),
    )(flat(yr), flat(yi), flat(hr), flat(hi), reg_f)

    return xr_f.reshape(B, Hf, Wf), xi_f.reshape(B, Hf, Wf)


# ------------------------------ module forward ------------------------------

def pure_wiener_forward(x, psf, weight, alpha):
    """x: (B, 1, H, W); psf: (B, 1, kh, kw); weight: (F, kh, kw); alpha: (1,)."""
    B = x.shape[0]
    H, W = x.shape[-2], x.shape[-1]
    xin = x.reshape(B, H, W).astype(jnp.float32)
    p = psf.reshape(B, psf.shape[-2], psf.shape[-1]).astype(jnp.float32)

    # Real inputs -> Hermitian spectra -> half-plane rfft2 is sufficient.
    Y = jnp.fft.rfft2(xin)                                  # (B, H, W//2+1)
    Hf = psf2otf_r(p, (H, W))                               # (B, H, W//2+1)
    Gf = psf2otf_r(weight.astype(jnp.float32), (H, W))      # (F, H, W//2+1)

    # Batch-invariant regularizer, hoisted out of the kernel and pre-scaled.
    reg = jnp.exp(alpha[0]) * jnp.sum(
        jnp.real(Gf) ** 2 + jnp.imag(Gf) ** 2, axis=0)      # (H, W//2+1) f32

    xr, xi = wiener_freq_combine(
        jnp.real(Y), jnp.imag(Y), jnp.real(Hf), jnp.imag(Hf), reg)

    out = jnp.fft.irfft2(xr + 1j * xi, s=(H, W))
    return out.reshape(x.shape).astype(x.dtype)


def pure_wiener_ref(x, psf, weight, alpha):
    """Pure-JAX reference (full fft2 path) for correctness checking."""
    B = x.shape[0]
    H, W = x.shape[-2], x.shape[-1]
    xin = x.reshape(B, H, W).astype(jnp.float32)
    p = psf.reshape(B, psf.shape[-2], psf.shape[-1]).astype(jnp.float32)
    Y = jnp.fft.fft2(xin)
    Hf = psf2otf_full(p, (H, W))
    Gf = psf2otf_full(weight.astype(jnp.float32), (H, W))
    lam = jnp.exp(alpha[0])
    denom = jnp.abs(Hf) ** 2 + lam * jnp.sum(jnp.abs(Gf) ** 2, axis=0)
    Xh = jnp.conj(Hf) * Y / denom
    return jnp.fft.ifft2(Xh).real.reshape(x.shape).astype(x.dtype)


# ------------------------------------ main -----------------------------------

if __name__ == "__main__":
    key = jax.random.PRNGKey(0)
    k_w, k_x, k_p = jax.random.split(key, 3)

    num_filters = 24
    filter_dim = (5, 5)
    B, C, Himg, Wimg = 2, 1, 32, 32

    # deterministic parameter init (mirrors __init__)
    weight = manual_norm(
        jax.random.normal(k_w, (num_filters, *filter_dim), dtype=jnp.float32))
    alpha = jnp.array([-2.0], dtype=jnp.float32)

    # deterministic inputs
    x = jax.random.normal(k_x, (B, C, Himg, Wimg), dtype=jnp.float32)
    psf = jnp.abs(jax.random.normal(k_p, (B, C, *filter_dim), dtype=jnp.float32))
    psf = psf / jnp.sum(psf, axis=(-2, -1), keepdims=True)  # blur kernel sums to 1

    out = pure_wiener_forward(x, psf, weight, alpha)
    out = jax.block_until_ready(out)

    ref = jax.block_until_ready(pure_wiener_ref(x, psf, weight, alpha))
    assert out.shape == x.shape
    assert jnp.allclose(out, ref, atol=1e-4, rtol=1e-4), "mismatch vs JAX reference"

    print("KERNEL_OK")
</pallas_src>

<mosaic_0001>
module attributes {stable_mosaic.version = 11 : i64} {
  func.func @_wiener_kernel(%arg0: i32, %arg1: i32, %arg2: memref<2x128xf32, #tpu.memory_space<vmem>>, %arg3: memref<2x128xf32, #tpu.memory_space<vmem>>, %arg4: memref<2x128xf32, #tpu.memory_space<vmem>>, %arg5: memref<2x128xf32, #tpu.memory_space<vmem>>, %arg6: memref<1x128xf32, #tpu.memory_space<vmem>>, %arg7: memref<2x128xf32, #tpu.memory_space<vmem>>, %arg8: memref<2x128xf32, #tpu.memory_space<vmem>>) attributes {dimension_semantics = [#tpu.dimension_semantics<parallel>, #tpu.dimension_semantics<parallel>], iteration_bounds = array<i64: 1, 5>, scalar_prefetch = 0 : i64, scratch_operands = 0 : i64, tpu.core_type = #tpu.core_type<tc>, window_params = [{transform_indices = @transform_0, window_bounds = array<i64: 2, 128>}, {transform_indices = @transform_1, window_bounds = array<i64: 2, 128>}, {transform_indices = @transform_2, window_bounds = array<i64: 2, 128>}, {transform_indices = @transform_3, window_bounds = array<i64: 2, 128>}, {transform_indices = @transform_4, window_bounds = array<i64: 1, 128>}, {transform_indices = @transform_5, window_bounds = array<i64: 2, 128>}, {transform_indices = @transform_6, window_bounds = array<i64: 2, 128>}]} {
    %c0 = arith.constant 0 : index
    %c0_0 = arith.constant 0 : index
    %0 = vector.load %arg2[%c0, %c0_0] : memref<2x128xf32, #tpu.memory_space<vmem>>, vector<2x128xf32>
    %c0_1 = arith.constant 0 : index
    %c0_2 = arith.constant 0 : index
    %1 = vector.load %arg3[%c0_1, %c0_2] : memref<2x128xf32, #tpu.memory_space<vmem>>, vector<2x128xf32>
    %c0_3 = arith.constant 0 : index
    %c0_4 = arith.constant 0 : index
    %2 = vector.load %arg4[%c0_3, %c0_4] : memref<2x128xf32, #tpu.memory_space<vmem>>, vector<2x128xf32>
    %c0_5 = arith.constant 0 : index
    %c0_6 = arith.constant 0 : index
    %3 = vector.load %arg5[%c0_5, %c0_6] : memref<2x128xf32, #tpu.memory_space<vmem>>, vector<2x128xf32>
    %c0_7 = arith.constant 0 : index
    %c0_8 = arith.constant 0 : index
    %4 = vector.load %arg6[%c0_7, %c0_8] : memref<1x128xf32, #tpu.memory_space<vmem>>, vector<1x128xf32>
    %5 = arith.mulf %2, %2 : vector<2x128xf32>
    %6 = arith.mulf %3, %3 : vector<2x128xf32>
    %7 = arith.addf %5, %6 : vector<2x128xf32>
    %8 = vector.broadcast %4 : vector<1x128xf32> to vector<2x128xf32>
    %9 = arith.addf %7, %8 : vector<2x128xf32>
    %10 = tpu.reciprocal %9 {approx = true} : vector<2x128xf32> -> vector<2x128xf32>
    %11 = arith.mulf %9, %10 : vector<2x128xf32>
    %cst = arith.constant 2.000000e+00 : f32
    %12 = vector.broadcast %cst : f32 to vector<2x128xf32>
    %13 = arith.subf %12, %11 : vector<2x128xf32>
    %14 = arith.mulf %10, %13 : vector<2x128xf32>
    %15 = arith.mulf %2, %0 : vector<2x128xf32>
    %16 = arith.mulf %3, %1 : vector<2x128xf32>
    %17 = arith.addf %15, %16 : vector<2x128xf32>
    %18 = arith.mulf %17, %14 : vector<2x128xf32>
    %c0_9 = arith.constant 0 : index
    %c0_10 = arith.constant 0 : index
    %19 = vector.load %arg7[%c0_9, %c0_10] : memref<2x128xf32, #tpu.memory_space<vmem>>, vector<2x128xf32>
    tpu.vector_store %arg7[%c0_9, %c0_10], %18 {strides = array<i32>} : memref<2x128xf32, #tpu.memory_space<vmem>>, vector<2x128xf32>,
    %20 = arith.mulf %2, %1 : vector<2x128xf32>
    %21 = arith.mulf %3, %0 : vector<2x128xf32>
    %22 = arith.subf %20, %21 : vector<2x128xf32>
    %23 = arith.mulf %22, %14 : vector<2x128xf32>
    %c0_11 = arith.constant 0 : index
    %c0_12 = arith.constant 0 : index
    %24 = vector.load %arg8[%c0_11, %c0_12] : memref<2x128xf32, #tpu.memory_space<vmem>>, vector<2x128xf32>
    tpu.vector_store %arg8[%c0_11, %c0_12], %23 {strides = array<i32>} : memref<2x128xf32, #tpu.memory_space<vmem>>, vector<2x128xf32>,
    return
  }
  func.func @transform_0(%arg0: i32, %arg1: i32) -> (i32, i32) {
    %c0_i32 = arith.constant 0 : i32
    return %arg0, %arg1 : i32, i32
  }
  func.func @transform_1(%arg0: i32, %arg1: i32) -> (i32, i32) {
    %c0_i32 = arith.constant 0 : i32
    return %arg0, %arg1 : i32, i32
  }
  func.func @transform_2(%arg0: i32, %arg1: i32) -> (i32, i32) {
    %c0_i32 = arith.constant 0 : i32
    return %arg0, %arg1 : i32, i32
  }
  func.func @transform_3(%arg0: i32, %arg1: i32) -> (i32, i32) {
    %c0_i32 = arith.constant 0 : i32
    return %arg0, %arg1 : i32, i32
  }
  func.func @transform_4(%arg0: i32, %arg1: i32) -> (i32, i32) {
    %c0_i32 = arith.constant 0 : i32
    %c0_i32_0 = arith.constant 0 : i32
    return %c0_i32, %arg1 : i32, i32
  }
  func.func @transform_5(%arg0: i32, %arg1: i32) -> (i32, i32) {
    %c0_i32 = arith.constant 0 : i32
    return %arg0, %arg1 : i32, i32
  }
  func.func @transform_6(%arg0: i32, %arg1: i32) -> (i32, i32) {
    %c0_i32 = arith.constant 0 : i32
    return %arg0, %arg1 : i32, i32
  }
}

</mosaic_0001>

<bundles_post_ra>
// kernel: tpu_custom_call.1
= control target key start
LH: loop header
LB: loop body
LE: loop exit
PB: predicated region body
PF: predicated region fallthrough
CT: control target
= control target key end

     0   :  { %s1336_s0 = inlined_call_operand.hbm [shape: f32[2,544], index: 0, kind: input, shape index: {}]   ;;  %s1337_s1 = inlined_call_operand.hbm [shape: f32[2,544], index: 1, kind: input, shape index: {}]   ;;  %s1338_s2 = inlined_call_operand.hbm [shape: f32[2,544], index: 2, kind: input, shape index: {}]   ;;  %s1339_s3 = inlined_call_operand.hbm [shape: f32[2,544], index: 3, kind: input, shape index: {}]   ;;  %s1340_s4 = inlined_call_operand.vmem [shape: f32[1,544], index: 4, kind: input, shape index: {}]   ;;  %s1341_s5 = inlined_call_operand.hbm [shape: f32[2,544], index: 5, kind: output, shape index: {0}]   ;;  %s1342_s6 = inlined_call_operand.hbm [shape: f32[2,544], index: 6, kind: output, shape index: {1}]  }
   0x1   :  { %1348 = sst [smem:[#allocation24_spill]] %s1337_s1 }
   0x2   :  { %12 = vsyncpa [#allocation3], 0 }
   0x3   :  { %14 = vsyncpa [#allocation3 + $0x1], 0 }
   0x4   :  { %15 = vsyncpa [#allocation6], 0 }
   0x5   :  { %17 = vsyncpa [#allocation6 + $0x1], 0 }
   0x6   :  { %18 = vsyncpa [#allocation9], 0 }
   0x7   :  { %20 = vsyncpa [#allocation9 + $0x1], 0 }
   0x8   :  { %21 = vsyncpa [#allocation4], 0 }
   0x9   :  { %23 = vsyncpa [#allocation4 + $0x1], 0 }
   0xa   :  { %24 = vsyncpa [#allocation12], 0 }
   0xb   :  { %26 = vsyncpa [#allocation12 + $0x1], 0  ;;  %s1077_s21 = smov 0   ;;  %s1079_s22 = smov 0  }
   0xc   :  { %s1081_s23 = smov 0   ;;  %s1083_s24 = smov 0  }
   0xd   :  { %s1085_s25 = smov 0   ;;  %s1087_s26 = smov 0  }
   0xe LB: > { %1349 = sst [smem:[#allocation18_spill]] %s1014_s21  ;;  %s1108_s27 = sadd.s32 4294967295, %s1034_s26   ;;  %s1034_s26 = sphi %s1087_s26, %s32_s26   ;;  %s1030_s25 = sphi %s1085_s25, %s1367_s25   ;;  %s1026_s24 = sphi %s1083_s24, %s1366_s24   ;;  %s1022_s23 = sphi %s1081_s23, %s1365_s23   ;;  %s1018_s22 = sphi %s1079_s22, %s1369_s22   ;;  %s1014_s21 = sphi %s1077_s21, %s1368_s21  }
   0xf   : > { %1350 = sst [smem:[#allocation19_spill]] %s1022_s23  ;;  %s695_s28 = sadd.s32 4294967294, %s1034_s26  }
  0x10   : > { %1351 = sst [smem:[#allocation20_spill]] %s1030_s25  ;;  %s41_s29 = sadd.s32 1, %s1030_s25 }
  0x11   : > { %s53_s30 = sadd.s32 1, %s1022_s23  ;;  %p42_p0 = scmp.ge.s32.totalorder %s41_s29, 5 }
  0x12   : > { %p60_p1 = scmp.ne.s32.totalorder %s1022_s23, %s1018_s22  ;;  %p61_p2 = scmp.eq.s32.totalorder %s1034_s26, 0 }
  0x13   : > { %p66_p3 = scmp.ne.s32.totalorder %s1018_s22, %s1014_s21  ;;  %s1371_s29 = smov (%p42_p0, %s41_s29), 0 }
  0x14   : > { %1352 = sst [smem:[#allocation21_spill]] %s1371_s29  ;;  %p1120_p4 = por %p61_p2, %p60_p1 }
  0x15   : > { %p67_p5 = scmp.eq.s32.totalorder %s1108_s27, 0  ;;  %s49_s8 = ssub.s32 %s1030_s25, %s1371_s29 }
  0x16   : > { %p202_p6 = scmp.eq.s32.totalorder %s1108_s27, 4  ;;  %p51_p7 = scmp.eq.s32.totalorder %s49_s8, 0 }
  0x17   : > { %p1128_p8 = por %p67_p5, %p66_p3  ;;  %p208_p10 = scmp.eq.s32.totalorder %s695_s28, 4 }
  0x18   : > { %p1132_p9 = por %p202_p6, %p60_p1  ;;  %p752_p12 = scmp.lt.s32.totalorder %s1034_s26, 5 }
  0x19   : > { %s1137_s11 = scalar_select %p51_p7, %s1022_s23, %s53_s30  }
  0x1a   : > { %p1139_p11 = por %p208_p10, %p66_p3  ;;  %s1145_s13 = sand.u32 1, %s1022_s23  }
  0x1b   : > { %1356 = sst [smem:[#allocation22_spill]] %s1137_s11  ;;  %s1148_s14 = sshll.u32 %s1145_s13, 1 }
  0x1c   : > { %s1357_s12 = scalar_select %p1139_p11, 1, 0 }
  0x1d   : > { %s1151_s15 = sshll.u32 %s1030_s25, 5  ;;  %p1155_p13 = pnand %p752_p12, %p1120_p4 }
  0x1e   : > { %1358 = sst [smem:[#allocation23_spill]] %s1357_s12  ;;  %s276_s17 = sand.u32 1, %s1034_s26  }
  0x1f   : > { %s1360_s1 = sld [smem:[#allocation24_spill]]  ;;  %s280_s28 = scalar_lea.vmem [#allocation5], %s1148_s14 }
  0x20   : > { %s289_s30 = sshll.u32 %s280_s28, 4  ;;  %p706_p0 = scmp.ge.s32.totalorder %s1034_s26, 1  ;;  %s290_s30 = int_to_ptr.vmem [resolvable:$true] %s289_s30 }
  0x21   : > { %p340_p1 = scmp.lt.s32.totalorder %s1034_s26, 6  ;;  %s1167_s8 = scalar_lea.sflag [#allocation6], %s276_s17 }
  0x22   : > { %p806_p2 = pneg %p1155_p13  ;;  %s817_s7 = scalar_lea.vmem %s290_s30, 32 }
  0x23   : > { %p818_p3 = scmp.ne.s32.totalorder %s290_s30, %s817_s7  ;;  %s1036_s29 = smov [#allocation5]  }
  0x24   : > { %s822_s25 = sshll.u32 %s1036_s29, 4  ;;  %s823_s25 = int_to_ptr.vmem [resolvable:$false] %s822_s25 }
  0x25   : > { %s287_s20 = scalar_lea.hbm %s1360_s1, %s1151_s15  ;;  %p820_p4 = pnand %p818_p3, %p806_p2 }
  0x26   : > { %s824_s18 = scalar_lea.vmem %s823_s25, 64  ;;  %p825_p6 = scmp.lt.s32.totalorder %s290_s30, %s823_s25 }
  0x27   : > { %p821_p5 = pneg %p820_p4  ;;  %p826_p7 = scmp.lt.s32.totalorder %s824_s18, %s817_s7 }
  0x29   : > { %p827_p10 = por %p826_p7, %p825_p6 }
  0x2b   : > { %p828_p12 = pnand %p827_p10, %p821_p5 }
  0x2d   : > { %831 = shalt.err (!%p828_p12)
}
  0x2e   : > { %738 = dma.hbm_to_vmem [thread:$0]  (!%p1155_p13), %s287_s20, 32, %s290_s30, %s1167_s8  }
  0x2f   : > { %p1181_p3 = pnand %p706_p0, %p340_p1  ;;  %s267_s19 = scalar_lea.hbm %s1336_s0, %s1151_s15 }
  0x30   : > { %s260_s28 = scalar_lea.vmem [#allocation2], %s1148_s14  ;;  %s307_s11 = scalar_lea.hbm %s1338_s2, %s1151_s15 }
  0x31   : > { %s269_s7 = sshll.u32 %s260_s28, 4  ;;  %s257_s23 = scalar_lea.sflag [#allocation3], %s1145_s13  ;;  %s270_s7 = int_to_ptr.vmem [resolvable:$true] %s269_s7 }
  0x32   : > { %s845_s12 = scalar_lea.vmem %s270_s7, 32  ;;  %s1037_s20 = smov [#allocation2]  }
  0x33   : > { %p846_p4 = scmp.ne.s32.totalorder %s270_s7, %s845_s12  ;;  %s850_s30 = sshll.u32 %s1037_s20, 4  ;;  %s851_s30 = int_to_ptr.vmem [resolvable:$false] %s850_s30 }
  0x34   : > { %s852_s21 = scalar_lea.vmem %s851_s30, 64  ;;  %p853_p5 = scmp.lt.s32.totalorder %s270_s7, %s851_s30 }
  0x35   : > { %p848_p0 = pnand %p846_p4, %p806_p2  ;;  %p854_p6 = scmp.lt.s32.totalorder %s852_s21, %s845_s12 }
  0x37   : > { %p849_p1 = pneg %p848_p0  ;;  %p855_p7 = por %p854_p6, %p853_p5 }
  0x39   : > { %p856_p10 = pnand %p855_p7, %p849_p1 }
  0x3b   : > { %859 = shalt.err (!%p856_p10)
}
  0x3c   : > { %735 = dma.hbm_to_vmem [thread:$0]  (!%p1155_p13), %s267_s19, 32, %s270_s7, %s257_s23  }
  0x3d   : > { %s300_s1 = scalar_lea.vmem [#allocation7], %s1148_s14  ;;  %s1038_s28 = smov [#allocation7]  }
  0x3e   : > { %s309_s25 = sshll.u32 %s300_s1, 4  ;;  %s878_s18 = sshll.u32 %s1038_s28, 4  ;;  %s310_s25 = int_to_ptr.vmem [resolvable:$true] %s309_s25  ;;  %s879_s18 = int_to_ptr.vmem [resolvable:$false] %s878_s18 }
  0x3f   : > { %s873_s17 = scalar_lea.vmem %s310_s25, 32  ;;  %s880_s21 = scalar_lea.vmem %s879_s18, 64 }
  0x40   : > { %p874_p12 = scmp.ne.s32.totalorder %s310_s25, %s873_s17  ;;  %p881_p1 = scmp.lt.s32.totalorder %s310_s25, %s879_s18 }
  0x41   : > { %p882_p5 = scmp.lt.s32.totalorder %s880_s21, %s873_s17 }
  0x42   : > { %p876_p4 = pnand %p874_p12, %p806_p2 }
  0x43   : > { %p883_p6 = por %p882_p5, %p881_p1 }
  0x44   : > { %p877_p0 = pneg %p876_p4 }
  0x46   : > { %p884_p7 = pnand %p883_p6, %p877_p0 }
  0x48   : > { %887 = shalt.err (!%p884_p7)
}
  0x49   : > { %741 = dma.hbm_to_vmem [thread:$0]  (!%p1155_p13), %s307_s11, 32, %s310_s25, %s1167_s8  }
  0x4a   : > { %s327_s20 = scalar_lea.hbm %s1339_s3, %s1151_s15  ;;  %s320_s30 = scalar_lea.vmem [#allocation8], %s1148_s14 }
  0x4b   : > { %s329_s1 = sshll.u32 %s320_s30, 4  ;;  %s317_s17 = scalar_lea.sflag [#allocation9], %s1145_s13  ;;  %s330_s1 = int_to_ptr.vmem [resolvable:$true] %s329_s1 }
  0x4c   : > { %s901_s28 = scalar_lea.vmem %s330_s1, 32  ;;  %s1039_s18 = smov [#allocation8]  }
  0x4d   : > { %p902_p10 = scmp.ne.s32.totalorder %s330_s1, %s901_s28  ;;  %s906_s21 = sshll.u32 %s1039_s18, 4  ;;  %s907_s21 = int_to_ptr.vmem [resolvable:$false] %s906_s21 }
  0x4e   : > { %s908_s23 = scalar_lea.vmem %s907_s21, 64  ;;  %p909_p0 = scmp.lt.s32.totalorder %s330_s1, %s907_s21 }
  0x4f   : > { %p904_p12 = pnand %p902_p10, %p806_p2  ;;  %p910_p1 = scmp.lt.s32.totalorder %s908_s23, %s901_s28 }
  0x51   : > { %p905_p4 = pneg %p904_p12  ;;  %p911_p5 = por %p910_p1, %p909_p0 }
  0x53   : > { %p912_p6 = pnand %p911_p5, %p905_p4 }
  0x55   : > { %915 = shalt.err (!%p912_p6)
}
  0x56   : > { %744 = dma.hbm_to_vmem [thread:$0]  (!%p1155_p13), %s327_s20, 32, %s330_s1, %s317_s17  }
  0x57   : > { %344 = sbr.rel (%p1181_p3) target bundleno = 164 (0xa4), region = 40  ;;  %s1226_s11 = sand.u32 (!%p1181_p3), 1, %s1018_s22  }
  0x58   : > { %s1229_s13 = sshll.u32 (!%p1181_p3), %s1226_s11, 1  ;;  %s347_s14 = scalar_lea.sflag (!%p1181_p3), [#allocation3], %s1226_s11 }
  0x59   : > { %s350_s15 = scalar_lea.vmem (!%p1181_p3), [#allocation2], %s1229_s13 }
  0x5c   : > { %993 = dma.done.wait (%p1128_p8), %s347_s14, 32  }
  0x5d   : > { %995 = vsyncadd (%p1128_p8), %s347_s14, 4294967264  ;;  %s355_s16 = sand.u32 1, %s1108_s27   ;;  %s359_s29 = scalar_lea.vmem [#allocation5], %s1229_s13 }
  0x5e   : > { %s356_s8 = scalar_lea.sflag [#allocation6], %s355_s16 }
  0x5f   : > { %997 = dma.done.wait (%p1128_p8), %s356_s8, 64  }
  0x60   : > { %999 = vsyncadd (%p1128_p8), %s356_s8, 4294967232  ;;  %s368_s25 = scalar_lea.vmem [#allocation7], %s1229_s13  ;;  %s374_s12 = scalar_lea.sflag [#allocation9], %s1226_s11 }
  0x61   : > { %s377_s19 = scalar_lea.vmem [#allocation8], %s1229_s13 }
  0x62   : > { %1001 = dma.done.wait (%p1128_p8), %s374_s12, 32  }
  0x63   : > { %1003 = vsyncadd (%p1128_p8), %s374_s12, 4294967264  ;;  %p429_p13 = scmp.lt.s32.totalorder %s1026_s24, 4  ;;  %v434_v0 = vld [vmem:[%s368_s25] sm:$0x3]  ;;  %v435_v1 = vld [vmem:[%s377_s19] sm:$0x3] }
  0x64   : > { %v437_v2 = vmul.f32 %v434_v0, %v434_v0  ;;  %v438_v3 = vmul.f32 %v435_v1, %v435_v1  ;;  %v432_v7 = vld [vmem:[%s350_s15] sm:$0x3]  ;;  %v433_v8 = vld [vmem:[%s359_s29] sm:$0x3]  ;;  %s421_s9 = scalar_lea.vmem [#allocation10], %s1229_s13  ;;  %s428_s17 = scalar_lea.vmem [#allocation11], %s1229_s13 }
  0x65   : > { %s430_s27 = scalar_select %p429_p13, %s1026_s24, 4  ;;  %v451_v9 = vmul.f32 %v434_v0, %v432_v7  ;;  %v452_v10 = vmul.f32 %v435_v1, %v433_v8  ;;  %v456_v11 = vmul.f32 %v434_v0, %v433_v8  ;;  %v457_v12 = vmul.f32 %v435_v1, %v432_v7 }
  0x66   : > { %v439_v5 = vadd.f32 %v438_v3, %v437_v2  ;;  %s482_s1 = sshll.u32 %s421_s9, 4  ;;  %s497_s28 = sshll.u32 %s428_s17, 4  ;;  %s1258_s1 = int_to_ptr.vmem [resolvable:$true] %s482_s1  ;;  %s1260_s28 = int_to_ptr.vmem [resolvable:$true] %s497_s28 }
  0x67   : > { %s431_s30 = scalar_lea.vmem %s1340_s4, %s430_s27  ;;  %v453_v16 = vadd.f32 %v452_v10, %v451_v9  ;;  %v458_v17 = vsub.f32 %v456_v11, %v457_v12  ;;  %s716_s18 = sshll.u32 %s1026_s24, 5 }
  0x68   : > { %v713_v4 = vld [vmem:[%s431_s30] ss:$0 sm:$0xff]  ;;  %s1265_s14 = scalar_lea.hbm %s1341_s5, %s716_s18  ;;  %s1270_s13 = scalar_lea.hbm %s1342_s6, %s716_s18 }
  0x69   : > { %v446_v6 = vadd.f32 %v713_v4, %v439_v5  ;;  %s462_s24 = scalar_lea.sflag [#allocation4], %s1226_s11  ;;  %s916_s8 = scalar_lea.vmem %s1258_s1, 32 }
  0x6a   : > { %p917_p8 = scmp.ne.s32.totalorder %s1258_s1, %s916_s8  ;;  %s1040_s29 = smov [#allocation10]  }
  0x6b   : > { %802 = vrcp.f32 %v446_v6  ;;  %s920_s25 = sshll.u32 %s1040_s29, 4  ;;  %s921_s25 = int_to_ptr.vmem [resolvable:$false] %s920_s25 }
  0x6c   : > { %p918_p2 = pnand %p917_p8, %p1132_p9  ;;  %s922_s12 = scalar_lea.vmem %s921_s25, 64 }
  0x6d   : > { %p923_p7 = scmp.lt.s32.totalorder %s1258_s1, %s921_s25  ;;  %p924_p10 = scmp.lt.s32.totalorder %s922_s12, %s916_s8 }
  0x6e   : > { %p919_p3 = pneg %p918_p2 }
  0x6f   : > { %p925_p12 = por %p924_p10, %p923_p7 }
  0x71   : > { %p926_p4 = pnand %p925_p12, %p919_p3 }
  0x78   : > { %v803_v13 = vpop.eup %802 }
  0x79   : > { %v448_v14 = vmul.f32 %v803_v13, %v446_v6 }
  0x7b   : > { %v449_v15 = vsub.f32 2.0, %v448_v14 }
  0x7d   : > { %v450_v18 = vmul.f32 %v803_v13, %v449_v15 }
  0x7f   : > { %v454_v19 = vmul.f32 %v453_v16, %v450_v18  ;;  %v459_v20 = vmul.f32 %v458_v17, %v450_v18 }
  0x81   : > { %455 = vst [vmem:[%s421_s9] sm:$0x3] %v454_v19  ;;  %460 = vst [vmem:[%s428_s17] sm:$0x3] %v459_v20 }
  0x82   : > { %929 = shalt.err (!%p926_p4)
}
  0x83   : > { %s930_s19 = scalar_lea.hbm %s1265_s14, 32  ;;  %s934_s20 = scalar_lea.hbm %s1341_s5, 160 }
  0x84   : > { %p931_p0 = scmp.ne.s32.totalorder %s1265_s14, %s930_s19  ;;  %p935_p6 = scmp.lt.s32.totalorder %s1265_s14, %s1341_s5 }
  0x85   : > { %p936_p13 = scmp.lt.s32.totalorder %s934_s20, %s930_s19 }
  0x86   : > { %p932_p1 = pnand %p931_p0, %p1132_p9 }
  0x87   : > { %p937_p8 = por %p936_p13, %p935_p6 }
  0x88   : > { %p933_p5 = pneg %p932_p1 }
  0x8a   : > { %p938_p2 = pnand %p937_p8, %p933_p5 }
  0x8c   : > { %941 = shalt.err (!%p938_p2)
}
  0x8d   : > { %728 = dma.vmem_to_hbm [thread:$0]  (%p1132_p9), %s1258_s1, 32, %s1265_s14, %s462_s24  }
  0x8e   : > { %s467_s17 = scalar_lea.sflag [#allocation12], %s1226_s11  ;;  %s942_s18 = scalar_lea.vmem %s1260_s28, 32 }
  0x8f   : > { %p943_p3 = scmp.ne.s32.totalorder %s1260_s28, %s942_s18  ;;  %s1041_s21 = smov [#allocation11]  }
  0x90   : > { %s946_s23 = sshll.u32 %s1041_s21, 4  ;;  %s947_s23 = int_to_ptr.vmem [resolvable:$false] %s946_s23 }
  0x91   : > { %p944_p7 = pnand %p943_p3, %p1132_p9  ;;  %s948_s15 = scalar_lea.vmem %s947_s23, 64 }
  0x92   : > { %p949_p12 = scmp.lt.s32.totalorder %s1260_s28, %s947_s23  ;;  %p950_p4 = scmp.lt.s32.totalorder %s948_s15, %s942_s18 }
  0x93   : > { %p945_p10 = pneg %p944_p7 }
  0x94   : > { %p951_p0 = por %p950_p4, %p949_p12 }
  0x96   : > { %p952_p1 = pnand %p951_p0, %p945_p10 }
  0x98   : > { %955 = shalt.err (!%p952_p1)
}
  0x99   : > { %s956_s1 = scalar_lea.hbm %s1270_s13, 32  ;;  %s960_s16 = scalar_lea.hbm %s1342_s6, 160 }
  0x9a   : > { %p957_p5 = scmp.ne.s32.totalorder %s1270_s13, %s956_s1  ;;  %p961_p8 = scmp.lt.s32.totalorder %s1270_s13, %s1342_s6 }
  0x9b   : > { %p962_p2 = scmp.lt.s32.totalorder %s960_s16, %s956_s1 }
  0x9c   : > { %p958_p6 = pnand %p957_p5, %p1132_p9 }
  0x9d   : > { %p963_p3 = por %p962_p2, %p961_p8 }
  0x9e   : > { %p959_p13 = pneg %p958_p6 }
  0xa0   : > { %p964_p7 = pnand %p963_p3, %p959_p13 }
  0xa2   : > { %967 = shalt.err (!%p964_p7)
}
  0xa3   : > { %729 = dma.vmem_to_hbm [thread:$0]  (%p1132_p9), %s1260_s28, 32, %s1270_s13, %s467_s17  }
  0xa4 PF: > { %s1362_s29 = sld [smem:[#allocation18_spill]]  ;;  %p753_p10 = scmp.ge.s32.totalorder %s1034_s26, 2 }
  0xa6   : > { %p746_p12 = pnand %p753_p10, %p1139_p11 }
  0xa8   : > { %p747_p4 = pneg %p746_p12 }
  0xaa   : > { %s509_s12 = sand.u32 1, %s1362_s29  }
  0xab   : > { %s510_s19 = scalar_lea.sflag [#allocation4], %s509_s12 }
  0xac   : > { %1005 = dma.done.wait (%p747_p4), %s510_s19, 32  }
  0xad   : > { %1007 = vsyncadd (%p747_p4), %s510_s19, 4294967264  ;;  %s519_s27 = scalar_lea.sflag [#allocation12], %s509_s12 }
  0xae   : > { %1009 = dma.done.wait (%p747_p4), %s519_s27, 32  }
  0xaf   : > { %1011 = vsyncadd (%p747_p4), %s519_s27, 4294967264  ;;  %s32_s26 = sadd.s32 1, %s1034_s26   ;;  %s1364_s10 = sld [smem:[#allocation19_spill]] }
  0xb0   : > { %p29_p0 = scmp.ge.s32.totalorder %s32_s26, 7   ;;  %s1365_s23 = sld [smem:[#allocation22_spill]] }
  0xb1   : > { %s1366_s24 = sld [smem:[#allocation20_spill]]  ;;  %s1368_s21 = smov %s1018_s22 }
  0xb2   : > { %s1367_s25 = sld [smem:[#allocation21_spill]]  ;;  %31 = sbr.rel (!%p29_p0) target bundleno = 14 (0xe), region = 142 }
  0xb5   : > { %s1369_s22 = smov %s1364_s10 }
  0xb7   :  { %524 = vsyncpa [#allocation3], 1 }
  0xb8   :  { %526 = vsyncpa [#allocation3 + $0x1], 1 }
  0xb9   :  { %527 = vsyncpa [#allocation6], 1 }
  0xba   :  { %529 = vsyncpa [#allocation6 + $0x1], 1 }
  0xbb   :  { %530 = vsyncpa [#allocation9], 1 }
  0xbc   :  { %532 = vsyncpa [#allocation9 + $0x1], 1 }
  0xbd   :  { %533 = vsyncpa [#allocation4], 1 }
  0xbe   :  { %535 = vsyncpa [#allocation4 + $0x1], 1 }
  0xbf   :  { %536 = vsyncpa [#allocation12], 1 }
  0xc0   :  { %538 = vsyncpa [#allocation12 + $0x1], 1 }

</bundles_post_ra>
